<compile_context>
chip_gen: v5e
topology: v5e:2x2
jax: 0.10.0
libtpu: 0.0.40
codegen_flags: <defaults>
</compile_context>

<pallas_src>
import jax
import jax.numpy as jnp
from jax.experimental import pallas as pl
from jax.experimental.pallas import tpu as pltpu

BN_EPS = 1e-5
HIDDEN = 128
LANE_PAD = 128  # lane-dense output width (dim_z <= 128 assumed)


def _bn_relu(h, gamma, beta):
    # BatchNorm1d in training mode (batch mean, biased batch variance) + ReLU,
    # with the affine folded into a single scale/shift on the (1,128) row.
    mean = jnp.mean(h, axis=0, keepdims=True)
    var = jnp.mean((h - mean) ** 2, axis=0, keepdims=True)
    scale = gamma * jax.lax.rsqrt(var + BN_EPS)
    shift = beta - mean * scale
    return jnp.maximum(h * scale + shift, 0.0)


def lwg_kernel(x_ref, w1_ref, w2_ref, w3_ref, w4_ref, vec_ref, o_ref):
    x = x_ref[...]
    vec = vec_ref[...]  # (8,128): rows 0..5 = g1,be1,g2,be2,g3,be3; row 6 = padded b4

    # Layer 1: bias dropped (cancelled by BN mean subtraction).
    h = jnp.dot(x, w1_ref[...], preferred_element_type=jnp.float32)
    h = _bn_relu(h, vec[0:1, :], vec[1:2, :])

    # Layer 2
    h = jnp.dot(h, w2_ref[...], preferred_element_type=jnp.float32)
    h = _bn_relu(h, vec[2:3, :], vec[3:4, :])

    # Layer 3
    h = jnp.dot(h, w3_ref[...], preferred_element_type=jnp.float32)
    h = _bn_relu(h, vec[4:5, :], vec[5:6, :])

    # Final linear into a lane-dense 128-wide tile (zero-padded weights/bias).
    out = jnp.dot(h, w4_ref[...], preferred_element_type=jnp.float32) + vec[6:7, :]
    o_ref[...] = out.astype(o_ref.dtype)


def lwg_forward(x, params):
    """x: [B, dim_g] float32.  params: the full PyTorch-style 14-array tuple."""
    (w1, b1, g1, be1,
     w2, b2, g2, be2,
     w3, b3, g3, be3,
     w4, b4) = params
    del b1, b2, b3  # pre-BN biases cancel exactly under batch normalization

    B = x.shape[0]
    dim_z = w4.shape[1]
    assert dim_z <= LANE_PAD, "this single-tile kernel assumes dim_z <= 128"

    # Zero-pad the final layer to 128 output lanes (unmasked lane-dense store).
    w4p = jnp.zeros((HIDDEN, LANE_PAD), jnp.float32).at[:, :dim_z].set(w4)
    b4p = jnp.zeros((LANE_PAD,), jnp.float32).at[:dim_z].set(b4.reshape(-1))

    # Pack all small per-layer vectors into a single (8,128) slab (1 DMA).
    vec = jnp.zeros((8, LANE_PAD), jnp.float32)
    vec = vec.at[0].set(g1.reshape(-1)).at[1].set(be1.reshape(-1))
    vec = vec.at[2].set(g2.reshape(-1)).at[3].set(be2.reshape(-1))
    vec = vec.at[4].set(g3.reshape(-1)).at[5].set(be3.reshape(-1))
    vec = vec.at[6].set(b4p)

    args = (x, w1, w2, w3, w4p, vec)
    full_spec = lambda a: pl.BlockSpec(a.shape, lambda *_: (0,) * a.ndim)

    out_padded = pl.pallas_call(
        lwg_kernel,
        out_shape=jax.ShapeDtypeStruct((B, LANE_PAD), jnp.float32),
        grid=(1,),
        in_specs=[full_spec(a) for a in args],
        out_specs=pl.BlockSpec((B, LANE_PAD), lambda *_: (0, 0)),
        compiler_params=pltpu.CompilerParams(
            dimension_semantics=("arbitrary",)),
    )(*args)

    # Slice off the zero-padded lanes outside the kernel.
    return out_padded[:, :dim_z]


def init_params(key, dim_g, dim_z, hidden=HIDDEN):
    """Deterministic init mimicking nn.Linear default (U[-1/sqrt(fan_in), ..])."""
    keys = jax.random.split(key, 8)

    def linear(kw, kb, fan_in, fan_out):
        bound = 1.0 / jnp.sqrt(fan_in)
        w = jax.random.uniform(kw, (fan_in, fan_out), jnp.float32, -bound, bound)
        b = jax.random.uniform(kb, (1, fan_out), jnp.float32, -bound, bound)
        return w, b

    w1, b1 = linear(keys[0], keys[1], dim_g, hidden)
    w2, b2 = linear(keys[2], keys[3], hidden, hidden)
    w3, b3 = linear(keys[4], keys[5], hidden, hidden)
    w4, b4 = linear(keys[6], keys[7], hidden, dim_z)

    ones = jnp.ones((1, hidden), jnp.float32)
    zeros = jnp.zeros((1, hidden), jnp.float32)

    return (w1, b1, ones, zeros,
            w2, b2, ones, zeros,
            w3, b3, ones, zeros,
            w4, b4)


def lwg_reference(x, params):
    # Faithful reference of the PyTorch module (biases included, training-mode BN).
    (w1, b1, g1, be1, w2, b2, g2, be2, w3, b3, g3, be3, w4, b4) = params

    def bn_relu(h, g, be):
        m = jnp.mean(h, axis=0, keepdims=True)
        v = jnp.mean((h - m) ** 2, axis=0, keepdims=True)
        return jnp.maximum((h - m) * jax.lax.rsqrt(v + BN_EPS) * g + be, 0.0)

    h = bn_relu(x @ w1 + b1, g1, be1)
    h = bn_relu(h @ w2 + b2, g2, be2)
    h = bn_relu(h @ w3 + b3, g3, be3)
    return h @ w4 + b4


if __name__ == "__main__":
    dim_g, dim_z, B = 32, 16, 8

    key = jax.random.PRNGKey(0)
    kx, kp = jax.random.split(key)
    x = jax.random.normal(kx, (B, dim_g), jnp.float32)
    params = init_params(kp, dim_g, dim_z)

    out = lwg_forward(x, params)
    jax.block_until_ready(out)

    ref = lwg_reference(x, params)
    assert out.shape == (B, dim_z)
    assert jnp.allclose(out, ref, atol=1e-4, rtol=1e-4)

    print("KERNEL_OK")
</pallas_src>

<mosaic_0001>
module attributes {stable_mosaic.version = 11 : i64} {
  func.func @lwg_kernel(%arg0: i32, %arg1: memref<8x32xf32, #tpu.memory_space<vmem>>, %arg2: memref<32x128xf32, #tpu.memory_space<vmem>>, %arg3: memref<128x128xf32, #tpu.memory_space<vmem>>, %arg4: memref<128x128xf32, #tpu.memory_space<vmem>>, %arg5: memref<128x128xf32, #tpu.memory_space<vmem>>, %arg6: memref<8x128xf32, #tpu.memory_space<vmem>>, %arg7: memref<8x128xf32, #tpu.memory_space<vmem>>) attributes {dimension_semantics = [#tpu.dimension_semantics<arbitrary>], iteration_bounds = array<i64: 1>, scalar_prefetch = 0 : i64, scratch_operands = 0 : i64, tpu.core_type = #tpu.core_type<tc>, window_params = [{pipeline_mode = #tpu.pipeline_mode<synchronous>, transform_indices = @transform_0, window_bounds = array<i64: 8, 32>}, {pipeline_mode = #tpu.pipeline_mode<synchronous>, transform_indices = @transform_1, window_bounds = array<i64: 32, 128>}, {pipeline_mode = #tpu.pipeline_mode<synchronous>, transform_indices = @transform_2, window_bounds = array<i64: 128, 128>}, {pipeline_mode = #tpu.pipeline_mode<synchronous>, transform_indices = @transform_3, window_bounds = array<i64: 128, 128>}, {pipeline_mode = #tpu.pipeline_mode<synchronous>, transform_indices = @transform_4, window_bounds = array<i64: 128, 128>}, {pipeline_mode = #tpu.pipeline_mode<synchronous>, transform_indices = @transform_5, window_bounds = array<i64: 8, 128>}, {pipeline_mode = #tpu.pipeline_mode<synchronous>, transform_indices = @transform_6, window_bounds = array<i64: 8, 128>}]} {
    %c0 = arith.constant 0 : index
    %c0_0 = arith.constant 0 : index
    %0 = vector.load %arg1[%c0, %c0_0] : memref<8x32xf32, #tpu.memory_space<vmem>>, vector<8x32xf32>
    %c0_1 = arith.constant 0 : index
    %c0_2 = arith.constant 0 : index
    %1 = vector.load %arg6[%c0_1, %c0_2] : memref<8x128xf32, #tpu.memory_space<vmem>>, vector<8x128xf32>
    %c0_3 = arith.constant 0 : index
    %c0_4 = arith.constant 0 : index
    %2 = vector.load %arg2[%c0_3, %c0_4] : memref<32x128xf32, #tpu.memory_space<vmem>>, vector<32x128xf32>
    %cst = arith.constant dense<0.000000e+00> : vector<8x128xf32>
    %3 = tpu.matmul %0, %2, %cst {dimension_numbers = #tpu.dot_dimension_numbers<[1], [0], [0], [1], [0, 0, 1, 1], [], []>} : vector<8x32xf32>, vector<32x128xf32>, vector<8x128xf32> -> vector<8x128xf32>
    %4 = vector.extract_strided_slice %1 {offsets = [0, 0], sizes = [1, 128], strides = [1, 1]} : vector<8x128xf32> to vector<1x128xf32>
    %5 = vector.extract_strided_slice %1 {offsets = [1, 0], sizes = [1, 128], strides = [1, 1]} : vector<8x128xf32> to vector<1x128xf32>
    %cst_5 = arith.constant dense<0.000000e+00> : vector<128xf32>
    %6 = vector.multi_reduction <add>, %3, %cst_5 [0] : vector<8x128xf32> to vector<128xf32>
    %7 = vector.shape_cast %6 : vector<128xf32> to vector<1x128xf32>
    %cst_6 = arith.constant 8.000000e+00 : f32
    %8 = vector.broadcast %cst_6 : f32 to vector<1x128xf32>
    %9 = arith.divf %7, %8 : vector<1x128xf32>
    %10 = vector.broadcast %9 : vector<1x128xf32> to vector<8x128xf32>
    %11 = arith.subf %3, %10 : vector<8x128xf32>
    %12 = arith.mulf %11, %11 : vector<8x128xf32>
    %cst_7 = arith.constant dense<0.000000e+00> : vector<128xf32>
    %13 = vector.multi_reduction <add>, %12, %cst_7 [0] : vector<8x128xf32> to vector<128xf32>
    %14 = vector.shape_cast %13 : vector<128xf32> to vector<1x128xf32>
    %cst_8 = arith.constant 8.000000e+00 : f32
    %15 = vector.broadcast %cst_8 : f32 to vector<1x128xf32>
    %16 = arith.divf %14, %15 : vector<1x128xf32>
    %cst_9 = arith.constant 9.99999974E-6 : f32
    %17 = vector.broadcast %cst_9 : f32 to vector<1x128xf32>
    %18 = arith.addf %16, %17 : vector<1x128xf32>
    %19 = math.rsqrt %18 : vector<1x128xf32>
    %20 = arith.mulf %4, %19 : vector<1x128xf32>
    %21 = arith.mulf %9, %20 : vector<1x128xf32>
    %22 = arith.subf %5, %21 : vector<1x128xf32>
    %23 = vector.broadcast %20 : vector<1x128xf32> to vector<8x128xf32>
    %24 = arith.mulf %3, %23 : vector<8x128xf32>
    %25 = vector.broadcast %22 : vector<1x128xf32> to vector<8x128xf32>
    %26 = arith.addf %24, %25 : vector<8x128xf32>
    %cst_10 = arith.constant 0.000000e+00 : f32
    %27 = vector.broadcast %cst_10 : f32 to vector<8x128xf32>
    %28 = arith.maximumf %26, %27 : vector<8x128xf32>
    %c0_11 = arith.constant 0 : index
    %c0_12 = arith.constant 0 : index
    %29 = vector.load %arg3[%c0_11, %c0_12] : memref<128x128xf32, #tpu.memory_space<vmem>>, vector<128x128xf32>
    %cst_13 = arith.constant dense<0.000000e+00> : vector<8x128xf32>
    %30 = tpu.matmul %28, %29, %cst_13 {dimension_numbers = #tpu.dot_dimension_numbers<[1], [0], [0], [1], [0, 0, 1, 1], [], []>} : vector<8x128xf32>, vector<128x128xf32>, vector<8x128xf32> -> vector<8x128xf32>
    %31 = vector.extract_strided_slice %1 {offsets = [2, 0], sizes = [1, 128], strides = [1, 1]} : vector<8x128xf32> to vector<1x128xf32>
    %32 = vector.extract_strided_slice %1 {offsets = [3, 0], sizes = [1, 128], strides = [1, 1]} : vector<8x128xf32> to vector<1x128xf32>
    %cst_14 = arith.constant dense<0.000000e+00> : vector<128xf32>
    %33 = vector.multi_reduction <add>, %30, %cst_14 [0] : vector<8x128xf32> to vector<128xf32>
    %34 = vector.shape_cast %33 : vector<128xf32> to vector<1x128xf32>
    %cst_15 = arith.constant 8.000000e+00 : f32
    %35 = vector.broadcast %cst_15 : f32 to vector<1x128xf32>
    %36 = arith.divf %34, %35 : vector<1x128xf32>
    %37 = vector.broadcast %36 : vector<1x128xf32> to vector<8x128xf32>
    %38 = arith.subf %30, %37 : vector<8x128xf32>
    %39 = arith.mulf %38, %38 : vector<8x128xf32>
    %cst_16 = arith.constant dense<0.000000e+00> : vector<128xf32>
    %40 = vector.multi_reduction <add>, %39, %cst_16 [0] : vector<8x128xf32> to vector<128xf32>
    %41 = vector.shape_cast %40 : vector<128xf32> to vector<1x128xf32>
    %cst_17 = arith.constant 8.000000e+00 : f32
    %42 = vector.broadcast %cst_17 : f32 to vector<1x128xf32>
    %43 = arith.divf %41, %42 : vector<1x128xf32>
    %cst_18 = arith.constant 9.99999974E-6 : f32
    %44 = vector.broadcast %cst_18 : f32 to vector<1x128xf32>
    %45 = arith.addf %43, %44 : vector<1x128xf32>
    %46 = math.rsqrt %45 : vector<1x128xf32>
    %47 = arith.mulf %31, %46 : vector<1x128xf32>
    %48 = arith.mulf %36, %47 : vector<1x128xf32>
    %49 = arith.subf %32, %48 : vector<1x128xf32>
    %50 = vector.broadcast %47 : vector<1x128xf32> to vector<8x128xf32>
    %51 = arith.mulf %30, %50 : vector<8x128xf32>
    %52 = vector.broadcast %49 : vector<1x128xf32> to vector<8x128xf32>
    %53 = arith.addf %51, %52 : vector<8x128xf32>
    %cst_19 = arith.constant 0.000000e+00 : f32
    %54 = vector.broadcast %cst_19 : f32 to vector<8x128xf32>
    %55 = arith.maximumf %53, %54 : vector<8x128xf32>
    %c0_20 = arith.constant 0 : index
    %c0_21 = arith.constant 0 : index
    %56 = vector.load %arg4[%c0_20, %c0_21] : memref<128x128xf32, #tpu.memory_space<vmem>>, vector<128x128xf32>
    %cst_22 = arith.constant dense<0.000000e+00> : vector<8x128xf32>
    %57 = tpu.matmul %55, %56, %cst_22 {dimension_numbers = #tpu.dot_dimension_numbers<[1], [0], [0], [1], [0, 0, 1, 1], [], []>} : vector<8x128xf32>, vector<128x128xf32>, vector<8x128xf32> -> vector<8x128xf32>
    %58 = vector.extract_strided_slice %1 {offsets = [4, 0], sizes = [1, 128], strides = [1, 1]} : vector<8x128xf32> to vector<1x128xf32>
    %59 = vector.extract_strided_slice %1 {offsets = [5, 0], sizes = [1, 128], strides = [1, 1]} : vector<8x128xf32> to vector<1x128xf32>
    %cst_23 = arith.constant dense<0.000000e+00> : vector<128xf32>
    %60 = vector.multi_reduction <add>, %57, %cst_23 [0] : vector<8x128xf32> to vector<128xf32>
    %61 = vector.shape_cast %60 : vector<128xf32> to vector<1x128xf32>
    %cst_24 = arith.constant 8.000000e+00 : f32
    %62 = vector.broadcast %cst_24 : f32 to vector<1x128xf32>
    %63 = arith.divf %61, %62 : vector<1x128xf32>
    %64 = vector.broadcast %63 : vector<1x128xf32> to vector<8x128xf32>
    %65 = arith.subf %57, %64 : vector<8x128xf32>
    %66 = arith.mulf %65, %65 : vector<8x128xf32>
    %cst_25 = arith.constant dense<0.000000e+00> : vector<128xf32>
    %67 = vector.multi_reduction <add>, %66, %cst_25 [0] : vector<8x128xf32> to vector<128xf32>
    %68 = vector.shape_cast %67 : vector<128xf32> to vector<1x128xf32>
    %cst_26 = arith.constant 8.000000e+00 : f32
    %69 = vector.broadcast %cst_26 : f32 to vector<1x128xf32>
    %70 = arith.divf %68, %69 : vector<1x128xf32>
    %cst_27 = arith.constant 9.99999974E-6 : f32
    %71 = vector.broadcast %cst_27 : f32 to vector<1x128xf32>
    %72 = arith.addf %70, %71 : vector<1x128xf32>
    %73 = math.rsqrt %72 : vector<1x128xf32>
    %74 = arith.mulf %58, %73 : vector<1x128xf32>
    %75 = arith.mulf %63, %74 : vector<1x128xf32>
    %76 = arith.subf %59, %75 : vector<1x128xf32>
    %77 = vector.broadcast %74 : vector<1x128xf32> to vector<8x128xf32>
    %78 = arith.mulf %57, %77 : vector<8x128xf32>
    %79 = vector.broadcast %76 : vector<1x128xf32> to vector<8x128xf32>
    %80 = arith.addf %78, %79 : vector<8x128xf32>
    %cst_28 = arith.constant 0.000000e+00 : f32
    %81 = vector.broadcast %cst_28 : f32 to vector<8x128xf32>
    %82 = arith.maximumf %80, %81 : vector<8x128xf32>
    %c0_29 = arith.constant 0 : index
    %c0_30 = arith.constant 0 : index
    %83 = vector.load %arg5[%c0_29, %c0_30] : memref<128x128xf32, #tpu.memory_space<vmem>>, vector<128x128xf32>
    %cst_31 = arith.constant dense<0.000000e+00> : vector<8x128xf32>
    %84 = tpu.matmul %82, %83, %cst_31 {dimension_numbers = #tpu.dot_dimension_numbers<[1], [0], [0], [1], [0, 0, 1, 1], [], []>} : vector<8x128xf32>, vector<128x128xf32>, vector<8x128xf32> -> vector<8x128xf32>
    %85 = vector.extract_strided_slice %1 {offsets = [6, 0], sizes = [1, 128], strides = [1, 1]} : vector<8x128xf32> to vector<1x128xf32>
    %86 = vector.broadcast %85 : vector<1x128xf32> to vector<8x128xf32>
    %87 = arith.addf %84, %86 : vector<8x128xf32>
    %c0_32 = arith.constant 0 : index
    %c0_33 = arith.constant 0 : index
    %88 = vector.load %arg7[%c0_32, %c0_33] : memref<8x128xf32, #tpu.memory_space<vmem>>, vector<8x128xf32>
    tpu.vector_store %arg7[%c0_32, %c0_33], %87 {strides = array<i32>} : memref<8x128xf32, #tpu.memory_space<vmem>>, vector<8x128xf32>,
    return
  }
  func.func @transform_0(%arg0: i32) -> (i32, i32) {
    %c0_i32 = arith.constant 0 : i32
    %c0_i32_0 = arith.constant 0 : i32
    %c0_i32_1 = arith.constant 0 : i32
    return %c0_i32, %c0_i32_0 : i32, i32
  }
  func.func @transform_1(%arg0: i32) -> (i32, i32) {
    %c0_i32 = arith.constant 0 : i32
    %c0_i32_0 = arith.constant 0 : i32
    %c0_i32_1 = arith.constant 0 : i32
    return %c0_i32, %c0_i32_0 : i32, i32
  }
  func.func @transform_2(%arg0: i32) -> (i32, i32) {
    %c0_i32 = arith.constant 0 : i32
    %c0_i32_0 = arith.constant 0 : i32
    %c0_i32_1 = arith.constant 0 : i32
    return %c0_i32, %c0_i32_0 : i32, i32
  }
  func.func @transform_3(%arg0: i32) -> (i32, i32) {
    %c0_i32 = arith.constant 0 : i32
    %c0_i32_0 = arith.constant 0 : i32
    %c0_i32_1 = arith.constant 0 : i32
    return %c0_i32, %c0_i32_0 : i32, i32
  }
  func.func @transform_4(%arg0: i32) -> (i32, i32) {
    %c0_i32 = arith.constant 0 : i32
    %c0_i32_0 = arith.constant 0 : i32
    %c0_i32_1 = arith.constant 0 : i32
    return %c0_i32, %c0_i32_0 : i32, i32
  }
  func.func @transform_5(%arg0: i32) -> (i32, i32) {
    %c0_i32 = arith.constant 0 : i32
    %c0_i32_0 = arith.constant 0 : i32
    %c0_i32_1 = arith.constant 0 : i32
    return %c0_i32, %c0_i32_0 : i32, i32
  }
  func.func @transform_6(%arg0: i32) -> (i32, i32) {
    %c0_i32 = arith.constant 0 : i32
    %c0_i32_0 = arith.constant 0 : i32
    %c0_i32_1 = arith.constant 0 : i32
    return %c0_i32, %c0_i32_0 : i32, i32
  }
}

</mosaic_0001>

<bundles_post_ra>
// kernel: tpu_custom_call.1
= control target key start
LH: loop header
LB: loop body
LE: loop exit
PB: predicated region body
PF: predicated region fallthrough
CT: control target
= control target key end

     0   :  { %11 = vsyncpa [#allocation3], 0  ;;  %s705_s0 = inlined_call_operand.hbm [shape: f32[8,32], index: 0, kind: input, shape index: {}]   ;;  %s706_s1 = inlined_call_operand.hbm [shape: f32[32,128], index: 1, kind: input, shape index: {}]   ;;  %s707_s2 = inlined_call_operand.hbm [shape: f32[128,128], index: 2, kind: input, shape index: {}]   ;;  %s708_s3 = inlined_call_operand.hbm [shape: f32[128,128], index: 3, kind: input, shape index: {}]   ;;  %s709_s4 = inlined_call_operand.hbm [shape: f32[128,128], index: 4, kind: input, shape index: {}]   ;;  %s710_s5 = inlined_call_operand.hbm [shape: f32[8,128], index: 5, kind: input, shape index: {}]   ;;  %s711_s6 = inlined_call_operand.hbm [shape: f32[8,128], index: 6, kind: output, shape index: {}]  }
   0x1   :  { %12 = vsyncpa [#allocation6], 0 }
   0x2   :  { %13 = vsyncpa [#allocation9], 0 }
   0x3   :  { %14 = vsyncpa [#allocation12], 0  ;;  %s31_s23 = sshll.u32 %s706_s1, 4  ;;  %s32_s23 = int_to_ptr.hbm [resolvable:$true] %s31_s23 }
   0x4   :  { %15 = vsyncpa [#allocation4], 0  ;;  %s592_s24 = smov [#allocation5]   ;;  %s57_s28 = sshll.u32 %s708_s3, 4  ;;  %s58_s28 = int_to_ptr.hbm [resolvable:$true] %s57_s28 }
   0x5   :  { %s33_s25 = sshll.u32 %s592_s24, 4  ;;  %s593_s29 = smov 128   ;;  %s34_s25 = int_to_ptr.vmem [resolvable:$true] %s33_s25 }
   0x6   :  { %s594_s30 = smov 8   ;;  %s595_s7 = smov [#allocation8]  }
   0x7   :  { %39 = dma.hbm_to_vmem [thread:$0]  %s32_s23, 512, %s34_s25, [#allocation6], %s593_s29, %s593_s29, %s594_s30  }
   0x8   :  { %s59_s8 = sshll.u32 %s595_s7, 4  ;;  %s21_s10 = sshll.u32 %s705_s0, 4  ;;  %s60_s8 = int_to_ptr.vmem [resolvable:$true] %s59_s8  ;;  %s22_s10 = int_to_ptr.hbm [resolvable:$true] %s21_s10 }
   0x9   :  { %65 = dma.hbm_to_vmem [thread:$0]  %s58_s28, 2048, %s60_s8, [#allocation9], %s593_s29, %s593_s29, %s594_s30  }
   0xa   :  { %s44_s12 = sshll.u32 %s707_s2, 4  ;;  %s596_s13 = smov [#allocation2]   ;;  %s45_s12 = int_to_ptr.hbm [resolvable:$true] %s44_s12 }
   0xb   :  { %s23_s14 = sshll.u32 %s596_s13, 4  ;;  %s597_s15 = smov [#allocation7]   ;;  %s24_s14 = int_to_ptr.vmem [resolvable:$true] %s23_s14 }
   0xc   :  { %26 = dma.hbm_to_vmem [thread:$0]  %s22_s10, 128, %s24_s14, [#allocation3]  }
   0xd   :  { %s46_s16 = sshll.u32 %s597_s15, 4  ;;  %s70_s0 = sshll.u32 %s709_s4, 4  ;;  %s47_s16 = int_to_ptr.vmem [resolvable:$true] %s46_s16  ;;  %s71_s0 = int_to_ptr.hbm [resolvable:$true] %s70_s0 }
   0xe   :  { %52 = dma.hbm_to_vmem [thread:$0]  %s45_s12, 2048, %s47_s16, [#allocation6], %s593_s29, %s593_s29, %s594_s30  }
   0xf   :  { %s84_s2 = sshll.u32 %s710_s5, 4  ;;  %s598_s21 = smov [#allocation10]   ;;  %s85_s2 = int_to_ptr.hbm [resolvable:$true] %s84_s2 }
  0x10   :  { %s72_s22 = sshll.u32 %s598_s21, 4  ;;  %s599_s23 = smov [#allocation11]   ;;  %s73_s22 = int_to_ptr.vmem [resolvable:$true] %s72_s22 }
  0x11   :  { %78 = dma.hbm_to_vmem [thread:$0]  %s71_s0, 2048, %s73_s22, [#allocation9], %s593_s29, %s593_s29, %s594_s30  }
  0x12   :  { %s86_s4 = sshll.u32 %s599_s23, 4  ;;  %s87_s4 = int_to_ptr.vmem [resolvable:$true] %s86_s4 }
  0x13   :  { %89 = dma.hbm_to_vmem [thread:$0]  %s85_s2, 128, %s87_s4, [#allocation12]  }
  0x14   :  { %582 = dma.done.wait [#allocation3], 128  }
  0x15   :  { %583 = vsyncadd [#allocation3], 4294967168 }
  0x16   :  { %584 = dma.done.wait [#allocation6], 2560  }
  0x17   :  { %585 = vsyncadd [#allocation6], 4294964736 }
  0x18   :  { %586 = dma.done.wait [#allocation9], 4096  }
  0x19   :  { %587 = vsyncadd [#allocation9], 4294963200 }
  0x1a   :  { %588 = dma.done.wait [#allocation12], 128  }
  0x1b   :  { %589 = vsyncadd [#allocation12], 4294967168  ;;  %v119_v0 = vld [vmem:[#allocation5 + $0x18] sm:$0xff]  ;;  %v118_v1 = vld [vmem:[#allocation5 + $0x10] sm:$0xff]  ;;  %vm120_vm0 = vcmask 261120   ;;  %v600_v5 = vmov 8.0  }
  0x1c   :  { %136 = vmatpush.msra.mxu0 %v119_v0  ;;  %v117_v2 = vld [vmem:[#allocation5 + $0x8] sm:$0xff]  ;;  %v116_v3 = vld [vmem:[#allocation5] sm:$0xff]  ;;  %v114_v4 = vld [vmem:[#allocation2] sm:$0xff]  ;;  %406 = vrcp.f32 %v600_v5  ;;  %s601_s5 = smov [#allocation13]   ;;  %s382_s27 = sshll.u32 %s711_s6, 4  ;;  %s383_s27 = int_to_ptr.hbm [resolvable:$true] %s382_s27 }
  0x1d   :  { %v204_v13 = vld [vmem:[#allocation7 + $0x78] sm:$0xff]  ;;  %v203_v15 = vld [vmem:[#allocation7 + $0x70] sm:$0xff]  ;;  %v202_v18 = vld [vmem:[#allocation7 + $0x68] sm:$0xff]  ;;  %s380_s24 = sshll.u32 %s601_s5, 4  ;;  %s381_s24 = int_to_ptr.vmem [resolvable:$true] %s380_s24 }
  0x1e   :  { %137 = vmatpush.msra.mxu0 %v118_v1  ;;  %205 = vmatpush.msra.mxu1 %v204_v13  ;;  %v201_v20 = vld [vmem:[#allocation7 + $0x60] sm:$0xff]  ;;  %v200_v23 = vld [vmem:[#allocation7 + $0x58] sm:$0xff]  ;;  %v199_v25 = vld [vmem:[#allocation7 + $0x50] sm:$0xff] }
  0x1f   :  { %v198_v27 = vld [vmem:[#allocation7 + $0x48] sm:$0xff]  ;;  %v197_v29 = vld [vmem:[#allocation7 + $0x40] sm:$0xff]  ;;  %v196_v31 = vld [vmem:[#allocation7 + $0x38] sm:$0xff] }
  0x20   :  { %138 = vmatpush.msra.mxu0 %v117_v2  ;;  %206 = vmatpush.msra.mxu1 %v203_v15  ;;  %v195_v33 = vld [vmem:[#allocation7 + $0x30] sm:$0xff]  ;;  %v194_v35 = vld [vmem:[#allocation7 + $0x28] sm:$0xff]  ;;  %v193_v37 = vld [vmem:[#allocation7 + $0x20] sm:$0xff] }
  0x21   :  { %v192_v38 = vld [vmem:[#allocation7 + $0x18] sm:$0xff]  ;;  %v191_v40 = vld [vmem:[#allocation7 + $0x10] sm:$0xff]  ;;  %v190_v42 = vld [vmem:[#allocation7 + $0x8] sm:$0xff] }
  0x22   :  { %139 = vmatpush.msra.mxu0 %v116_v3  ;;  %v407_v6 = vpop.eup %406  ;;  %207 = vmatpush.msra.mxu1 %v202_v18  ;;  %v189_v44 = vld [vmem:[#allocation7] sm:$0xff]  ;;  %v278_v2 = vld [vmem:[#allocation8 + $0x78] sm:$0xff] }
  0x23   :  { %395 = vmatmul.msk.f32.vlgmr.msra.gmra.mxu0 %vm120_vm0, %v114_v4  ;;  %v151_v7 = vmul.f32 8.0, %v407_v6  ;;  %vm155_vm1 = vweird.f32 %v407_v6  ;;  %v676_v51 = vld [vmem:[#allocation11] sm:$0xff]  ;;  %279 = vmatpush.msra.mxu2 %v278_v2  ;;  %v277_v4 = vld [vmem:[#allocation8 + $0x70] sm:$0xff]  ;;  %v270_v18 = vld [vmem:[#allocation8 + $0x38] sm:$0xff] }
  0x24   :  { %208 = vmatpush.msra.mxu1 %v201_v20  ;;  %v269_v20 = vld [vmem:[#allocation8 + $0x30] sm:$0xff]  ;;  %v346_v2 = vld [vmem:[#allocation10 + $0x48] sm:$0xff] }
  0x25   :  { %v152_v8 = vsub.f32 1.0, %v151_v7  ;;  %280 = vmatpush.msra.mxu2 %v277_v4  ;;  %v345_v4 = vld [vmem:[#allocation10 + $0x40] sm:$0xff] }
  0x26   :  { %209 = vmatpush.msra.mxu1 %v200_v23  ;;  %v268_v23 = vld [vmem:[#allocation8 + $0x28] sm:$0xff] }
  0x27   :  { %v153_v11 = vmul.f32 %v407_v6, %v152_v8  ;;  %v275_v8 = vld [vmem:[#allocation8 + $0x60] sm:$0xff] }
  0x28   :  { %210 = vmatpush.msra.mxu1 %v199_v25  ;;  %v267_v25 = vld [vmem:[#allocation8 + $0x20] sm:$0xff] }
  0x29   :  { %v154_v16 = vadd.f32 %v407_v6, %v153_v11 }
  0x2a   :  { %211 = vmatpush.msra.mxu1 %v198_v27 }
  0x2b   :  { %v671_v21 = vsel %vm155_vm1, %v407_v6, %v154_v16  ;;  %v276_v6 = vld [vmem:[#allocation8 + $0x68] sm:$0xff]  ;;  %v271_v16 = vld [vmem:[#allocation8 + $0x40] sm:$0xff] }
  0x2c   :  { %212 = vmatpush.msra.mxu1 %v197_v29  ;;  %281 = vmatpush.msra.mxu2 %v276_v6  ;;  %v344_v6 = vld [vmem:[#allocation10 + $0x38] sm:$0xff] }
  0x2e   :  { %213 = vmatpush.msra.mxu1 %v196_v31  ;;  %282 = vmatpush.msra.mxu2 %v275_v8  ;;  %v343_v8 = vld [vmem:[#allocation10 + $0x30] sm:$0xff] }
  0x30   :  { %214 = vmatpush.msra.mxu1 %v195_v33 }
  0x32   :  { %215 = vmatpush.msra.mxu1 %v194_v35 }
  0x34   :  { %216 = vmatpush.msra.mxu1 %v193_v37 }
  0x36   :  { %217 = vmatpush.msra.mxu1 %v192_v38 }
  0x38   :  { %218 = vmatpush.msra.mxu1 %v191_v40 }
  0x3a   :  { %219 = vmatpush.msra.mxu1 %v190_v42 }
  0x3c   :  { %220 = vmatpush.msra.mxu1 %v189_v44 }
  0xa0   :  { %v667_v9 = vpop.f32.mrf.mxu0 }
  0xa1   :  { %v144_v10 = vrot.slane %v667_v9, 4 }
  0xa3   :  { %v145_v12 = vadd.f32 %v144_v10, %v667_v9  ;;  %v274_v10 = vld [vmem:[#allocation8 + $0x58] sm:$0xff] }
  0xa4   :  { %283 = vmatpush.msra.mxu2 %v274_v10  ;;  %v342_v10 = vld [vmem:[#allocation10 + $0x28] sm:$0xff] }
  0xa5   :  { %v146_v14 = vrot.slane %v145_v12, 2 }
  0xa7   :  { %v147_v17 = vadd.f32 %v146_v14, %v145_v12  ;;  %v273_v12 = vld [vmem:[#allocation8 + $0x50] sm:$0xff]  ;;  %v272_v14 = vld [vmem:[#allocation8 + $0x48] sm:$0xff] }
  0xa8   :  { %284 = vmatpush.msra.mxu2 %v273_v12  ;;  %v341_v12 = vld [vmem:[#allocation10 + $0x20] sm:$0xff] }
  0xa9   :  { %v148_v19 = vrot.slane %v147_v17, 1 }
  0xaa   :  { %285 = vmatpush.msra.mxu2 %v272_v14 }
  0xab   :  { %v149_v22 = vadd.f32 %v148_v19, %v147_v17 }
  0xac   :  { %286 = vmatpush.msra.mxu2 %v271_v16 }
  0xad   :  { %v157_v24 = vmul.f32 %v671_v21, %v149_v22 }
  0xae   :  { %287 = vmatpush.msra.mxu2 %v270_v18 }
  0xaf   :  { %v158_v26 = vsub.f32 %v667_v9, %v157_v24 }
  0xb0   :  { %288 = vmatpush.msra.mxu2 %v269_v20 }
  0xb1   :  { %v159_v28 = vmul.f32 %v158_v26, %v158_v26  ;;  %v266_v26 = vld [vmem:[#allocation8 + $0x18] sm:$0xff] }
  0xb2   :  { %289 = vmatpush.msra.mxu2 %v268_v23 }
  0xb3   :  { %v160_v30 = vrot.slane %v159_v28, 4 }
  0xb4   :  { %290 = vmatpush.msra.mxu2 %v267_v25 }
  0xb5   :  { %v161_v32 = vadd.f32 %v160_v30, %v159_v28  ;;  %v265_v28 = vld [vmem:[#allocation8 + $0x10] sm:$0xff]  ;;  %v264_v30 = vld [vmem:[#allocation8 + $0x8] sm:$0xff] }
  0xb6   :  { %291 = vmatpush.msra.mxu2 %v266_v26 }
  0xb7   :  { %v162_v34 = vrot.slane %v161_v32, 2 }
  0xb8   :  { %292 = vmatpush.msra.mxu2 %v265_v28 }
  0xb9   :  { %v163_v36 = vadd.f32 %v162_v34, %v161_v32  ;;  %v263_v32 = vld [vmem:[#allocation8] sm:$0xff] }
  0xba   :  { %293 = vmatpush.msra.mxu2 %v264_v30 }
  0xbb   :  { %v164_v39 = vrot.slane %v163_v36, 1 }
  0xbc   :  { %294 = vmatpush.msra.mxu2 %v263_v32 }
  0xbd   :  { %v165_v41 = vadd.f32 %v164_v39, %v163_v36 }
  0xbf   :  { %v166_v43 = vmul.f32 %v165_v41, %v671_v21 }
  0xc1   :  { %v167_v45 = vadd.f32 1e-05, %v166_v43 }
  0xc3   :  { %408 = vrsqrt.f32 %v167_v45  ;;  %vm174_vm3 = vweird.f32 %v167_v45 }
  0xc9   :  { %v409_v46 = vpop.eup %408 }
  0xca   :  { %v169_v47 = vmul.f32 %v409_v46, %v167_v45  ;;  %vm175_vm2 = vweird.f32 %v409_v46 }
  0xcb   :  { %vm176_vm4 = vmor %vm174_vm3, %vm175_vm2 }
  0xcc   :  { %v170_v48 = vmul.f32 %v409_v46, %v169_v47 }
  0xce   :  { %v171_v49 = vmul.f32 0.5, %v170_v48 }
  0xd0   :  { %v172_v50 = vsub.f32 1.5, %v171_v49 }
  0xd2   :  { %v173_v52 = vmul.f32 %v409_v46, %v172_v50 }
  0xd4   :  { %v177_v53 = vsel %vm176_vm4, %v409_v46, %v173_v52 }
  0xd5   :  { %v178_v54 = vmul.f32 %v177_v53, %v676_v51 }
  0xd7   :  { %v179_v55 = vmul.f32 %v178_v54, %v157_v24  ;;  %v184_v56 = vperm.slane %v178_v54, 0  ;;  %v352_v54 = vld [vmem:[#allocation10 + $0x78] sm:$0xff] }
  0xd8   :  { %354 = vmatpush.msra.mxu3 %v352_v54 }
  0xd9   :  { %v181_v57 = vrot.slane %v179_v55, 7  ;;  %v185_v59 = vmul.f32 %v184_v56, %v667_v9  ;;  %v351_v56 = vld [vmem:[#allocation10 + $0x70] sm:$0xff] }
  0xda   :  { %355 = vmatpush.msra.mxu3 %v351_v56 }
  0xdb   :  { %v183_v58 = vsub.f32 %v676_v51, %v181_v57 }
  0xdd   :  { %v186_v60 = vperm.slane %v183_v58, 1  ;;  %v350_v58 = vld [vmem:[#allocation10 + $0x68] sm:$0xff] }
  0xde   :  { %356 = vmatpush.msra.mxu3 %v350_v58 }
  0xdf   :  { %v187_v61 = vadd.f32 %v186_v60, %v185_v59  ;;  %v349_v60 = vld [vmem:[#allocation10 + $0x60] sm:$0xff] }
  0xe0   :  { %357 = vmatpush.msra.mxu3 %v349_v60 }
  0xe1   :  { %v188_v62 = vmax.f32 %v187_v61, 0.0 }
  0xe3   :  { %221 = vmatmul.f32.vlgmr.msra.gmra.mxu1 %v188_v62  ;;  %v348_v62 = vld [vmem:[#allocation10 + $0x58] sm:$0xff] }
  0xe4   :  { %358 = vmatpush.msra.mxu3 %v348_v62 }
 0x160   :  { %v681_v63 = vpop.f32.mrf.mxu1 }
 0x161   :  { %v225_v0 = vrot.slane %v681_v63, 4 }
 0x163   :  { %v226_v1 = vadd.f32 %v225_v0, %v681_v63  ;;  %v347_v0 = vld [vmem:[#allocation10 + $0x50] sm:$0xff] }
 0x164   :  { %359 = vmatpush.msra.mxu3 %v347_v0 }
 0x165   :  { %v227_v3 = vrot.slane %v226_v1, 2 }
 0x166   :  { %360 = vmatpush.msra.mxu3 %v346_v2 }
 0x167   :  { %v228_v5 = vadd.f32 %v227_v3, %v226_v1 }
 0x168   :  { %361 = vmatpush.msra.mxu3 %v345_v4 }
 0x169   :  { %v229_v7 = vrot.slane %v228_v5, 1 }
 0x16a   :  { %362 = vmatpush.msra.mxu3 %v344_v6 }
 0x16b   :  { %v230_v9 = vadd.f32 %v229_v7, %v228_v5 }
 0x16c   :  { %363 = vmatpush.msra.mxu3 %v343_v8 }
 0x16d   :  { %v231_v11 = vmul.f32 %v230_v9, %v671_v21 }
 0x16e   :  { %364 = vmatpush.msra.mxu3 %v342_v10 }
 0x16f   :  { %v232_v13 = vsub.f32 %v681_v63, %v231_v11 }
 0x170   :  { %365 = vmatpush.msra.mxu3 %v341_v12 }
 0x171   :  { %v233_v15 = vmul.f32 %v232_v13, %v232_v13  ;;  %v340_v13 = vld [vmem:[#allocation10 + $0x18] sm:$0xff] }
 0x172   :  { %366 = vmatpush.msra.mxu3 %v340_v13 }
 0x173   :  { %v234_v17 = vrot.slane %v233_v15, 4 }
 0x175   :  { %v235_v19 = vadd.f32 %v234_v17, %v233_v15  ;;  %v339_v15 = vld [vmem:[#allocation10 + $0x10] sm:$0xff]  ;;  %v338_v17 = vld [vmem:[#allocation10 + $0x8] sm:$0xff] }
 0x176   :  { %367 = vmatpush.msra.mxu3 %v339_v15 }
 0x177   :  { %v236_v22 = vrot.slane %v235_v19, 2 }
 0x178   :  { %368 = vmatpush.msra.mxu3 %v338_v17 }
 0x179   :  { %v237_v24 = vadd.f32 %v236_v22, %v235_v19  ;;  %v337_v19 = vld [vmem:[#allocation10] sm:$0xff] }
 0x17a   :  { %369 = vmatpush.msra.mxu3 %v337_v19 }
 0x17b   :  { %v238_v27 = vrot.slane %v237_v24, 1 }
 0x17d   :  { %v239_v29 = vadd.f32 %v238_v27, %v237_v24 }
 0x17f   :  { %v240_v31 = vmul.f32 %v239_v29, %v671_v21 }
 0x181   :  { %v241_v33 = vadd.f32 1e-05, %v240_v31 }
 0x183   :  { %410 = vrsqrt.f32 %v241_v33  ;;  %vm248_vm6 = vweird.f32 %v241_v33 }
 0x189   :  { %v411_v34 = vpop.eup %410 }
 0x18a   :  { %v243_v35 = vmul.f32 %v411_v34, %v241_v33  ;;  %vm249_vm5 = vweird.f32 %v411_v34 }
 0x18b   :  { %vm250_vm7 = vmor %vm248_vm6, %vm249_vm5 }
 0x18c   :  { %v244_v36 = vmul.f32 %v411_v34, %v243_v35 }
 0x18e   :  { %v245_v37 = vmul.f32 0.5, %v244_v36 }
 0x190   :  { %v246_v38 = vsub.f32 1.5, %v245_v37  ;;  %v353_v37 = vperm.slane %v676_v51, 6 }
 0x192   :  { %v247_v39 = vmul.f32 %v411_v34, %v246_v38 }
 0x194   :  { %v251_v40 = vsel %vm250_vm7, %v411_v34, %v247_v39 }
 0x195   :  { %v252_v41 = vmul.f32 %v251_v40, %v676_v51 }
 0x197   :  { %v253_v42 = vmul.f32 %v252_v41, %v231_v11  ;;  %v258_v43 = vperm.slane %v252_v41, 2 }
 0x199   :  { %v255_v44 = vrot.slane %v253_v42, 7  ;;  %v259_v46 = vmul.f32 %v258_v43, %v681_v63 }
 0x19b   :  { %v257_v45 = vsub.f32 %v676_v51, %v255_v44 }
 0x19d   :  { %v260_v47 = vperm.slane %v257_v45, 3 }
 0x19f   :  { %v261_v48 = vadd.f32 %v260_v47, %v259_v46 }
 0x1a1   :  { %v262_v49 = vmax.f32 %v261_v48, 0.0 }
 0x1a3   :  { %295 = vmatmul.f32.vlgmr.msra.gmra.mxu2 %v262_v49 }
 0x226   :  { %v691_v50 = vpop.f32.mrf.mxu2 }
 0x227   :  { %v299_v52 = vrot.slane %v691_v50, 4 }
 0x229   :  { %v300_v53 = vadd.f32 %v299_v52, %v691_v50 }
 0x22b   :  { %v301_v55 = vrot.slane %v300_v53, 2 }
 0x22d   :  { %v302_v57 = vadd.f32 %v301_v55, %v300_v53 }
 0x22f   :  { %v303_v59 = vrot.slane %v302_v57, 1 }
 0x231   :  { %v304_v61 = vadd.f32 %v303_v59, %v302_v57 }
 0x233   :  { %v305_v63 = vmul.f32 %v304_v61, %v671_v21 }
 0x235   :  { %v306_v1 = vsub.f32 %v691_v50, %v305_v63 }
 0x237   :  { %v307_v3 = vmul.f32 %v306_v1, %v306_v1 }
 0x239   :  { %v308_v5 = vrot.slane %v307_v3, 4 }
 0x23b   :  { %v309_v7 = vadd.f32 %v308_v5, %v307_v3 }
 0x23d   :  { %v310_v9 = vrot.slane %v309_v7, 2 }
 0x23f   :  { %v311_v11 = vadd.f32 %v310_v9, %v309_v7 }
 0x241   :  { %v312_v14 = vrot.slane %v311_v11, 1 }
 0x243   :  { %v313_v16 = vadd.f32 %v312_v14, %v311_v11 }
 0x245   :  { %v314_v18 = vmul.f32 %v313_v16, %v671_v21 }
 0x247   :  { %v315_v20 = vadd.f32 1e-05, %v314_v18 }
 0x249   :  { %412 = vrsqrt.f32 %v315_v20  ;;  %vm322_vm9 = vweird.f32 %v315_v20 }
 0x24f   :  { %v413_v22 = vpop.eup %412 }
 0x250   :  { %v317_v23 = vmul.f32 %v413_v22, %v315_v20  ;;  %vm323_vm8 = vweird.f32 %v413_v22 }
 0x251   :  { %vm324_vm10 = vmor %vm322_vm9, %vm323_vm8 }
 0x252   :  { %v318_v24 = vmul.f32 %v413_v22, %v317_v23 }
 0x254   :  { %v319_v25 = vmul.f32 0.5, %v318_v24 }
 0x256   :  { %v320_v26 = vsub.f32 1.5, %v319_v25 }
 0x258   :  { %v321_v27 = vmul.f32 %v413_v22, %v320_v26 }
 0x25a   :  { %v325_v28 = vsel %vm324_vm10, %v413_v22, %v321_v27 }
 0x25b   :  { %v326_v29 = vmul.f32 %v325_v28, %v676_v51 }
 0x25d   :  { %v327_v30 = vmul.f32 %v326_v29, %v305_v63  ;;  %v332_v31 = vperm.slane %v326_v29, 4 }
 0x25f   :  { %v329_v21 = vrot.slane %v327_v30, 7  ;;  %v333_v33 = vmul.f32 %v332_v31, %v691_v50 }
 0x261   :  { %v331_v32 = vsub.f32 %v676_v51, %v329_v21 }
 0x263   :  { %v334_v34 = vperm.slane %v331_v32, 5 }
 0x265   :  { %v335_v35 = vadd.f32 %v334_v34, %v333_v33 }
 0x267   :  { %v336_v36 = vmax.f32 %v335_v35, 0.0 }
 0x269   :  { %370 = vmatmul.f32.vlgmr.msra.gmra.mxu3 %v336_v36 }
 0x2ec   :  { %v371_v38 = vpop.f32.mrf.mxu3 }
 0x2ed   :  { %v372_v39 = vadd.f32 %v371_v38, %v353_v37 }
 0x2ef   :  { %374 = vst [vmem:[#allocation13] sm:$0xff] %v372_v39 }
 0x2f0   :  { %385 = dma.vmem_to_hbm [thread:$0]  %s381_s24, 128, %s383_s27, [#allocation4]  }
 0x2f1   :  { %590 = dma.done.wait [#allocation4], 128  }
 0x2f2   :  { %591 = vsyncadd [#allocation4], 4294967168 }
 0x2f3   :  { %390 = vsyncpa [#allocation3], 1 }
 0x2f4   :  { %391 = vsyncpa [#allocation6], 1 }
 0x2f5   :  { %392 = vsyncpa [#allocation9], 1 }
 0x2f6   :  { %393 = vsyncpa [#allocation12], 1 }
 0x2f7   :  { %394 = vsyncpa [#allocation4], 1 }

</bundles_post_ra>
